<compile_context>
chip_gen: v5e
topology: v5e:2x2
jax: 0.10.0
libtpu: 0.0.40
codegen_flags: <defaults>
</compile_context>

<pallas_src>
import functools

import jax
import jax.numpy as jnp
from jax.experimental import pallas as pl
from jax.experimental.pallas import tpu as pltpu


LANE = 128            # lane (channel) padding
SUBLANE = 8           # sublane (node) padding for the fused path
FUSE_MAX_NODES = 1024  # fused 3-layer path when padded N <= this (fits VMEM)


def _round_up(x, m):
    return ((x + m - 1) // m) * m


def _pad2d(a, rows, cols):
    r, c = a.shape
    return jnp.pad(a, ((0, rows - r), (0, cols - c)))


# ---------------------------------------------------------------------------
# Plain-JAX glue: dense symmetric-normalized adjacency (PyG gcn_norm).
# ---------------------------------------------------------------------------
def gcn_norm_dense(edge_index, edge_weight, num_nodes):
    src = edge_index[0]
    tgt = edge_index[1]
    loop = jnp.arange(num_nodes, dtype=src.dtype)          # self loops, weight 1
    src = jnp.concatenate([src, loop])
    tgt = jnp.concatenate([tgt, loop])
    ew = jnp.concatenate(
        [edge_weight.astype(jnp.float32), jnp.ones((num_nodes,), jnp.float32)]
    )
    deg = jnp.zeros((num_nodes,), jnp.float32).at[tgt].add(ew)
    deg_inv_sqrt = jnp.where(deg > 0, 1.0 / jnp.sqrt(deg), 0.0)
    norm = deg_inv_sqrt[src] * ew * deg_inv_sqrt[tgt]
    return jnp.zeros((num_nodes, num_nodes), jnp.float32).at[tgt, src].add(norm)


# ---------------------------------------------------------------------------
# Fused 3-layer kernel (small graphs): A_hat + h stay resident in VMEM.
# ---------------------------------------------------------------------------
def _gcn_fused_kernel(a_ref, x_ref, w1_ref, b1_ref, w2_ref, b2_ref,
                      w3_ref, b3_ref, out_ref):
    a = a_ref[...]                                          # [N, N] bf16

    def layer(h, w_ref, b_ref, relu):
        xw = jnp.dot(h, w_ref[...], preferred_element_type=jnp.float32)
        agg = jnp.dot(a, xw.astype(jnp.bfloat16),
                      preferred_element_type=jnp.float32)
        out = agg + b_ref[...]
        if relu:
            out = jnp.maximum(out, 0.0)
        return out

    h1 = layer(x_ref[...], w1_ref, b1_ref, True).astype(jnp.bfloat16)
    h2 = layer(h1, w2_ref, b2_ref, True).astype(jnp.bfloat16)
    out_ref[...] = layer(h2, w3_ref, b3_ref, False).astype(out_ref.dtype)


def _forward_fused(a_hat, x, weights, biases):
    n_pad = a_hat.shape[0]
    c_out_pad = weights[-1].shape[1]
    args = [a_hat, x]
    for w, b in zip(weights, biases):
        args += [w, b]
    return pl.pallas_call(
        _gcn_fused_kernel,
        out_shape=jax.ShapeDtypeStruct((n_pad, c_out_pad), jnp.float32),
        in_specs=[pl.BlockSpec(arr.shape, lambda: (0, 0)) for arr in args],
        out_specs=pl.BlockSpec((n_pad, c_out_pad), lambda: (0, 0)),
    )(*args)


# ---------------------------------------------------------------------------
# Tiled per-layer path (large graphs).
# ---------------------------------------------------------------------------
def _xw_kernel(x_ref, w_ref, xw_ref):
    xw_ref[...] = jnp.dot(
        x_ref[...], w_ref[...], preferred_element_type=jnp.float32
    ).astype(xw_ref.dtype)


def _feature_transform(x, w, tm):
    """XW = X @ W, row-tiled; output bf16 (small, stays resident for stage 2)."""
    n_pad, c_in = x.shape
    c_out = w.shape[1]
    return pl.pallas_call(
        _xw_kernel,
        out_shape=jax.ShapeDtypeStruct((n_pad, c_out), jnp.bfloat16),
        grid_spec=pltpu.PrefetchScalarGridSpec(
            num_scalar_prefetch=0,
            grid=(n_pad // tm,),
            in_specs=[pl.BlockSpec((tm, c_in), lambda i: (i, 0)),
                      pl.BlockSpec((c_in, c_out), lambda i: (0, 0))],
            out_specs=pl.BlockSpec((tm, c_out), lambda i: (i, 0))),
        compiler_params=pltpu.CompilerParams(
            dimension_semantics=("parallel",)),
    )(x, w)


def _agg_kernel(a_ref, xw_ref, b_ref, out_ref, acc_ref, *, apply_relu):
    @pl.when(pl.program_id(1) == 0)
    def _():
        acc_ref[...] = jnp.zeros_like(acc_ref)

    acc_ref[...] += jnp.dot(a_ref[...], xw_ref[...],
                            preferred_element_type=jnp.float32)

    @pl.when(pl.program_id(1) == pl.num_programs(1) - 1)
    def _():
        out = acc_ref[...] + b_ref[...]
        if apply_relu:
            out = jnp.maximum(out, 0.0)
        out_ref[...] = out.astype(out_ref.dtype)


def _aggregate(a_hat, xw, b, tm, tk, apply_relu, out_dtype):
    """out = A_hat @ XW + b (+ReLU), tiled over (rows, reduction)."""
    n_pad = a_hat.shape[0]
    c_out = xw.shape[1]
    kernel = functools.partial(_agg_kernel, apply_relu=apply_relu)
    return pl.pallas_call(
        kernel,
        out_shape=jax.ShapeDtypeStruct((n_pad, c_out), out_dtype),
        grid_spec=pltpu.PrefetchScalarGridSpec(
            num_scalar_prefetch=0,
            grid=(n_pad // tm, n_pad // tk),
            in_specs=[pl.BlockSpec((tm, tk), lambda i, k: (i, k)),
                      pl.BlockSpec((tk, c_out), lambda i, k: (k, 0)),
                      pl.BlockSpec((1, c_out), lambda i, k: (0, 0))],
            out_specs=pl.BlockSpec((tm, c_out), lambda i, k: (i, 0)),
            scratch_shapes=[pltpu.VMEM((tm, c_out), jnp.float32)]),
        compiler_params=pltpu.CompilerParams(
            dimension_semantics=("parallel", "arbitrary")),
    )(a_hat, xw, b)


def _choose_tiles(n):
    # v6e/v7x MXU is 256-wide -> 256/512 tiles when the graph is big enough.
    if n >= 2048:
        tk = 512
    elif n >= 512:
        tk = 256
    else:
        tk = 128
    tm = min(256, tk)
    return tm, tk


def _forward_tiled(a_hat, x, weights, biases, tm, tk):
    h = x
    num_layers = len(weights)
    for li, (w, b) in enumerate(zip(weights, biases)):
        last = li == num_layers - 1
        xw = _feature_transform(h, w, tm)
        h = _aggregate(a_hat, xw, b, tm, tk,
                       apply_relu=not last,
                       out_dtype=jnp.float32 if last else jnp.bfloat16)
    return h


# ---------------------------------------------------------------------------
# Parameters + encoder forward: conv1 -> relu -> conv2 -> relu -> conv3
# ---------------------------------------------------------------------------
def glorot(key, shape):
    fan_in, fan_out = shape
    limit = jnp.sqrt(6.0 / (fan_in + fan_out))
    return jax.random.uniform(key, shape, jnp.float32, -limit, limit)


def init_params(key, in_channels, out_channels):
    k1, k2, k3 = jax.random.split(key, 3)
    return {
        "w1": glorot(k1, (in_channels, out_channels)),
        "b1": jnp.zeros((1, out_channels), jnp.float32),
        "w2": glorot(k2, (out_channels, 2 * out_channels)),
        "b2": jnp.zeros((1, 2 * out_channels), jnp.float32),
        "w3": glorot(k3, (2 * out_channels, out_channels)),
        "b3": jnp.zeros((1, out_channels), jnp.float32),
    }


def gcn_encoder_forward(params, x, edge_index, edge_weight, *, force_tiled=False):
    n, c_in = x.shape
    c_out = params["w3"].shape[1]

    # dense symmetric-normalized adjacency (plain-JAX glue), built once and
    # shared (cast to bf16) across all three layers.
    a_hat = gcn_norm_dense(edge_index, edge_weight, n)

    # pad channel dims to 128-lane multiples; matmul operands -> bf16
    weights, biases = [], []
    c_prev = _round_up(c_in, LANE)
    for w, b in ((params["w1"], params["b1"]),
                 (params["w2"], params["b2"]),
                 (params["w3"], params["b3"])):
        c_next = _round_up(w.shape[1], LANE)
        weights.append(_pad2d(w, c_prev, c_next).astype(jnp.bfloat16))
        biases.append(_pad2d(b, 1, c_next).astype(jnp.float32))
        c_prev = c_next

    if (not force_tiled) and _round_up(n, SUBLANE) <= FUSE_MAX_NODES:
        n_pad = _round_up(n, SUBLANE)
        a_pad = _pad2d(a_hat, n_pad, n_pad).astype(jnp.bfloat16)
        x_pad = _pad2d(x, n_pad, weights[0].shape[0]).astype(jnp.bfloat16)
        z = _forward_fused(a_pad, x_pad, weights, biases)
    else:
        tm, tk = _choose_tiles(n)
        n_pad = _round_up(n, max(tm, tk))
        a_pad = _pad2d(a_hat, n_pad, n_pad).astype(jnp.bfloat16)
        x_pad = _pad2d(x, n_pad, weights[0].shape[0]).astype(jnp.bfloat16)
        z = _forward_tiled(a_pad, x_pad, weights, biases, tm, tk)

    return z[:n, :c_out]


def gcn_encoder_reference(params, x, edge_index, edge_weight):
    """Pure-JAX f32 reference (same math, no padding / bf16)."""
    a_hat = gcn_norm_dense(edge_index, edge_weight, x.shape[0])
    h = jnp.maximum(a_hat @ (x @ params["w1"]) + params["b1"], 0.0)
    h = jnp.maximum(a_hat @ (h @ params["w2"]) + params["b2"], 0.0)
    return a_hat @ (h @ params["w3"]) + params["b3"]


if __name__ == "__main__":
    key = jax.random.PRNGKey(0)
    k_x, k_e, k_w, k_p, k_x2, k_e2, k_w2 = jax.random.split(key, 7)

    num_nodes = 16
    in_channels = 16
    out_channels = 20
    num_edges = 48

    x = jax.random.normal(k_x, (num_nodes, in_channels), jnp.float32)
    edge_index = jax.random.randint(k_e, (2, num_edges), 0, num_nodes, jnp.int32)
    edge_weight = jax.random.uniform(k_w, (num_edges,), jnp.float32, 0.1, 1.0)
    params = init_params(k_p, in_channels, out_channels)

    # --- fused small-graph path (single pallas_call, everything resident) ---
    z = jax.block_until_ready(
        gcn_encoder_forward(params, x, edge_index, edge_weight))
    assert z.shape == (num_nodes, out_channels), z.shape
    assert z.dtype == jnp.float32
    ref = gcn_encoder_reference(params, x, edge_index, edge_weight)
    assert jnp.allclose(z, ref, rtol=5e-2, atol=5e-2), \
        float(jnp.max(jnp.abs(z - ref)))

    # --- tiled multi-step-grid path (accumulator + pl.when), moderate size ---
    n2, e2 = 640, 4096
    x2 = jax.random.normal(k_x2, (n2, in_channels), jnp.float32)
    ei2 = jax.random.randint(k_e2, (2, e2), 0, n2, jnp.int32)
    ew2 = jax.random.uniform(k_w2, (e2,), jnp.float32, 0.1, 1.0)
    z2 = jax.block_until_ready(
        gcn_encoder_forward(params, x2, ei2, ew2, force_tiled=True))
    assert z2.shape == (n2, out_channels), z2.shape
    ref2 = gcn_encoder_reference(params, x2, ei2, ew2)
    assert jnp.allclose(z2, ref2, rtol=1e-1, atol=1e-1), \
        float(jnp.max(jnp.abs(z2 - ref2)))

    print("KERNEL_OK")
</pallas_src>

<mosaic_0001>
module attributes {stable_mosaic.version = 11 : i64} {
  func.func @_gcn_fused_kernel(%arg0: memref<16x16xbf16, #tpu.memory_space<vmem>>, %arg1: memref<16x128xbf16, #tpu.memory_space<vmem>>, %arg2: memref<128x128xbf16, #tpu.memory_space<vmem>>, %arg3: memref<1x128xf32, #tpu.memory_space<vmem>>, %arg4: memref<128x128xbf16, #tpu.memory_space<vmem>>, %arg5: memref<1x128xf32, #tpu.memory_space<vmem>>, %arg6: memref<128x128xbf16, #tpu.memory_space<vmem>>, %arg7: memref<1x128xf32, #tpu.memory_space<vmem>>, %arg8: memref<16x128xf32, #tpu.memory_space<vmem>>) attributes {dimension_semantics = [], scalar_prefetch = 0 : i64, scratch_operands = 0 : i64, tpu.core_type = #tpu.core_type<tc>} {
    %c0 = arith.constant 0 : index
    %c0_0 = arith.constant 0 : index
    %0 = vector.load %arg0[%c0, %c0_0] : memref<16x16xbf16, #tpu.memory_space<vmem>>, vector<16x16xbf16>
    %c0_1 = arith.constant 0 : index
    %c0_2 = arith.constant 0 : index
    %1 = vector.load %arg1[%c0_1, %c0_2] : memref<16x128xbf16, #tpu.memory_space<vmem>>, vector<16x128xbf16>
    %c0_3 = arith.constant 0 : index
    %c0_4 = arith.constant 0 : index
    %2 = vector.load %arg2[%c0_3, %c0_4] : memref<128x128xbf16, #tpu.memory_space<vmem>>, vector<128x128xbf16>
    %cst = arith.constant dense<0.000000e+00> : vector<16x128xf32>
    %3 = tpu.matmul %1, %2, %cst {dimension_numbers = #tpu.dot_dimension_numbers<[1], [0], [0], [1], [0, 0, 1, 1], [], []>} : vector<16x128xbf16>, vector<128x128xbf16>, vector<16x128xf32> -> vector<16x128xf32>
    %4 = arith.truncf %3 : vector<16x128xf32> to vector<16x128xbf16>
    %cst_5 = arith.constant dense<0.000000e+00> : vector<16x128xf32>
    %5 = tpu.matmul %0, %4, %cst_5 {dimension_numbers = #tpu.dot_dimension_numbers<[1], [0], [0], [1], [0, 0, 1, 1], [], []>} : vector<16x16xbf16>, vector<16x128xbf16>, vector<16x128xf32> -> vector<16x128xf32>
    %c0_6 = arith.constant 0 : index
    %c0_7 = arith.constant 0 : index
    %6 = vector.load %arg3[%c0_6, %c0_7] : memref<1x128xf32, #tpu.memory_space<vmem>>, vector<1x128xf32>
    %7 = vector.broadcast %6 : vector<1x128xf32> to vector<16x128xf32>
    %8 = arith.addf %5, %7 : vector<16x128xf32>
    %cst_8 = arith.constant 0.000000e+00 : f32
    %9 = vector.broadcast %cst_8 : f32 to vector<16x128xf32>
    %10 = arith.maximumf %8, %9 : vector<16x128xf32>
    %11 = arith.truncf %10 : vector<16x128xf32> to vector<16x128xbf16>
    %c0_9 = arith.constant 0 : index
    %c0_10 = arith.constant 0 : index
    %12 = vector.load %arg4[%c0_9, %c0_10] : memref<128x128xbf16, #tpu.memory_space<vmem>>, vector<128x128xbf16>
    %cst_11 = arith.constant dense<0.000000e+00> : vector<16x128xf32>
    %13 = tpu.matmul %11, %12, %cst_11 {dimension_numbers = #tpu.dot_dimension_numbers<[1], [0], [0], [1], [0, 0, 1, 1], [], []>} : vector<16x128xbf16>, vector<128x128xbf16>, vector<16x128xf32> -> vector<16x128xf32>
    %14 = arith.truncf %13 : vector<16x128xf32> to vector<16x128xbf16>
    %cst_12 = arith.constant dense<0.000000e+00> : vector<16x128xf32>
    %15 = tpu.matmul %0, %14, %cst_12 {dimension_numbers = #tpu.dot_dimension_numbers<[1], [0], [0], [1], [0, 0, 1, 1], [], []>} : vector<16x16xbf16>, vector<16x128xbf16>, vector<16x128xf32> -> vector<16x128xf32>
    %c0_13 = arith.constant 0 : index
    %c0_14 = arith.constant 0 : index
    %16 = vector.load %arg5[%c0_13, %c0_14] : memref<1x128xf32, #tpu.memory_space<vmem>>, vector<1x128xf32>
    %17 = vector.broadcast %16 : vector<1x128xf32> to vector<16x128xf32>
    %18 = arith.addf %15, %17 : vector<16x128xf32>
    %cst_15 = arith.constant 0.000000e+00 : f32
    %19 = vector.broadcast %cst_15 : f32 to vector<16x128xf32>
    %20 = arith.maximumf %18, %19 : vector<16x128xf32>
    %21 = arith.truncf %20 : vector<16x128xf32> to vector<16x128xbf16>
    %c0_16 = arith.constant 0 : index
    %c0_17 = arith.constant 0 : index
    %22 = vector.load %arg6[%c0_16, %c0_17] : memref<128x128xbf16, #tpu.memory_space<vmem>>, vector<128x128xbf16>
    %cst_18 = arith.constant dense<0.000000e+00> : vector<16x128xf32>
    %23 = tpu.matmul %21, %22, %cst_18 {dimension_numbers = #tpu.dot_dimension_numbers<[1], [0], [0], [1], [0, 0, 1, 1], [], []>} : vector<16x128xbf16>, vector<128x128xbf16>, vector<16x128xf32> -> vector<16x128xf32>
    %24 = arith.truncf %23 : vector<16x128xf32> to vector<16x128xbf16>
    %cst_19 = arith.constant dense<0.000000e+00> : vector<16x128xf32>
    %25 = tpu.matmul %0, %24, %cst_19 {dimension_numbers = #tpu.dot_dimension_numbers<[1], [0], [0], [1], [0, 0, 1, 1], [], []>} : vector<16x16xbf16>, vector<16x128xbf16>, vector<16x128xf32> -> vector<16x128xf32>
    %c0_20 = arith.constant 0 : index
    %c0_21 = arith.constant 0 : index
    %26 = vector.load %arg7[%c0_20, %c0_21] : memref<1x128xf32, #tpu.memory_space<vmem>>, vector<1x128xf32>
    %27 = vector.broadcast %26 : vector<1x128xf32> to vector<16x128xf32>
    %28 = arith.addf %25, %27 : vector<16x128xf32>
    %c0_22 = arith.constant 0 : index
    %c0_23 = arith.constant 0 : index
    %29 = vector.load %arg8[%c0_22, %c0_23] : memref<16x128xf32, #tpu.memory_space<vmem>>, vector<16x128xf32>
    tpu.vector_store %arg8[%c0_22, %c0_23], %28 {strides = array<i32>} : memref<16x128xf32, #tpu.memory_space<vmem>>, vector<16x128xf32>,
    return
  }
}

</mosaic_0001>

<bundles_post_ra>
// kernel: tpu_custom_call.1
= control target key start
LH: loop header
LB: loop body
LE: loop exit
PB: predicated region body
PF: predicated region fallthrough
CT: control target
= control target key end

     0   :  { %13 = vsyncpa [#allocation3], 0  ;;  %s831_s0 = inlined_call_operand.hbm [shape: bf16[16,16], index: 0, kind: input, shape index: {}]   ;;  %s832_s1 = inlined_call_operand.hbm [shape: bf16[16,128], index: 1, kind: input, shape index: {}]   ;;  %s833_s2 = inlined_call_operand.hbm [shape: bf16[128,128], index: 2, kind: input, shape index: {}]   ;;  %s834_s3 = inlined_call_operand.vmem [shape: f32[1,128], index: 3, kind: input, shape index: {}]   ;;  %s835_s4 = inlined_call_operand.hbm [shape: bf16[128,128], index: 4, kind: input, shape index: {}]   ;;  %s836_s5 = inlined_call_operand.vmem [shape: f32[1,128], index: 5, kind: input, shape index: {}]   ;;  %s837_s6 = inlined_call_operand.hbm [shape: bf16[128,128], index: 6, kind: input, shape index: {}]   ;;  %s838_s7 = inlined_call_operand.vmem [shape: f32[1,128], index: 7, kind: input, shape index: {}]   ;;  %s839_s8 = inlined_call_operand.hbm [shape: f32[16,128], index: 8, kind: output, shape index: {}]  }
   0x1   :  { %14 = vsyncpa [#allocation6], 0 }
   0x2   :  { %15 = vsyncpa [#allocation9], 0 }
   0x3   :  { %16 = vsyncpa [#allocation4], 0  ;;  %s34_s29 = sshll.u32 %s832_s1, 4  ;;  %s746_s30 = smov [#allocation5]   ;;  %s35_s29 = int_to_ptr.hbm [resolvable:$true] %s34_s29 }
   0x4   :  { %s36_s9 = sshll.u32 %s746_s30, 4  ;;  %s62_s12 = sshll.u32 %s835_s4, 4  ;;  %s37_s9 = int_to_ptr.vmem [resolvable:$true] %s36_s9  ;;  %s63_s12 = int_to_ptr.hbm [resolvable:$true] %s62_s12 }
   0x5   :  { %s747_s13 = smov 64   ;;  %s748_s14 = smov 4  }
   0x6   :  { %42 = dma.hbm_to_vmem [thread:$0]  %s35_s29, 128, %s37_s9, [#allocation6], %s747_s13, %s747_s13, %s748_s14  }
   0x7   :  { %s749_s15 = smov [#allocation8]   ;;  %s21_s19 = sshll.u32 %s831_s0, 4  ;;  %s22_s19 = int_to_ptr.hbm [resolvable:$true] %s21_s19 }
   0x8   :  { %s64_s16 = sshll.u32 %s749_s15, 4  ;;  %s47_s21 = sshll.u32 %s833_s2, 4  ;;  %s65_s16 = int_to_ptr.vmem [resolvable:$true] %s64_s16  ;;  %s48_s21 = int_to_ptr.hbm [resolvable:$true] %s47_s21 }
   0x9   :  { %70 = dma.hbm_to_vmem [thread:$0]  %s63_s12, 1024, %s65_s16, [#allocation9], %s747_s13, %s747_s13, %s748_s14  }
   0xa   :  { %s750_s22 = smov [#allocation2]   ;;  %s751_s4 = smov [#allocation7]  }
   0xb   :  { %s23_s23 = sshll.u32 %s750_s22, 4  ;;  %s49_s24 = sshll.u32 %s751_s4, 4  ;;  %s24_s23 = int_to_ptr.vmem [resolvable:$true] %s23_s23  ;;  %s50_s24 = int_to_ptr.vmem [resolvable:$true] %s49_s24 }
   0xc   :  { %29 = dma.hbm_to_vmem [thread:$0]  %s22_s19, 128, %s24_s23, [#allocation3], %s747_s13, %s747_s13, %s748_s14  }
   0xd   :  { %s77_s27 = sshll.u32 %s837_s6, 4  ;;  %s752_s0 = smov [#allocation10]   ;;  %s78_s27 = int_to_ptr.hbm [resolvable:$true] %s77_s27 }
   0xe   :  { %55 = dma.hbm_to_vmem [thread:$0]  %s48_s21, 1024, %s50_s24, [#allocation6], %s747_s13, %s747_s13, %s748_s14  }
   0xf   :  { %s79_s28 = sshll.u32 %s752_s0, 4  ;;  %s80_s28 = int_to_ptr.vmem [resolvable:$true] %s79_s28 }
  0x10   :  { %85 = dma.hbm_to_vmem [thread:$0]  %s78_s27, 1024, %s80_s28, [#allocation9], %s747_s13, %s747_s13, %s748_s14  }
  0x11   :  { %738 = dma.done.wait [#allocation3], 128  }
  0x12   :  { %739 = vsyncadd [#allocation3], 4294967168 }
  0x13   :  { %740 = dma.done.wait [#allocation6], 1152  }
  0x14   :  { %741 = vsyncadd [#allocation6], 4294966144 }
  0x15   :  { %742 = dma.done.wait [#allocation9], 2048  }
  0x16   :  { %743 = vsyncadd [#allocation9], 4294965248  ;;  %v564_v0 = vld [vmem:[#allocation7 + $0x38] sm:$0xff]  ;;  %v563_v1 = vld [vmem:[#allocation7 + $0x30] sm:$0xff]  ;;  %vm207_vm0 = vcmask 130048   ;;  %s433_s13 = sshll.u32 %s839_s8, 4  ;;  %s434_s13 = int_to_ptr.hbm [resolvable:$true] %s433_s13 }
  0x17   :  { %183 = vmatpush.bf16.msra.mxu0 %v564_v0  ;;  %v562_v2 = vld [vmem:[#allocation7 + $0x28] sm:$0xff]  ;;  %v561_v3 = vld [vmem:[#allocation7 + $0x20] sm:$0xff]  ;;  %v560_v4 = vld [vmem:[#allocation7 + $0x18] sm:$0xff]  ;;  %s754_s14 = smov 128   ;;  %s755_s15 = smov 8  }
  0x18   :  { %v559_v5 = vld [vmem:[#allocation7 + $0x10] sm:$0xff]  ;;  %v558_v6 = vld [vmem:[#allocation7 + $0x8] sm:$0xff]  ;;  %v557_v7 = vld [vmem:[#allocation7] sm:$0xff] }
  0x19   :  { %v556_v8 = vld [vmem:[#allocation5] sm:$0xff]  ;;  %v571_v10 = vld [vmem:[#allocation8 + $0x30] sm:$0xff]  ;;  %v570_v11 = vld [vmem:[#allocation8 + $0x28] sm:$0xff] }
  0x1a   :  { %v572_v9 = vld [vmem:[#allocation8 + $0x38] sm:$0xff]  ;;  %v569_v12 = vld [vmem:[#allocation8 + $0x20] sm:$0xff]  ;;  %v555_v16 = vld [vmem:[#allocation2] sm:$0xff] }
  0x1b   :  { %184 = vmatpush.bf16.msra.mxu0 %v563_v1  ;;  %292 = vmatpush.bf16.msra.mxu2 %v572_v9  ;;  %v568_v17 = vld [vmem:[#allocation8 + $0x18] sm:$0xff]  ;;  %v567_v18 = vld [vmem:[#allocation8 + $0x10] sm:$0xff]  ;;  %v566_v19 = vld [vmem:[#allocation8 + $0x8] sm:$0xff] }
  0x1c   :  { %v565_v20 = vld [vmem:[#allocation8] sm:$0xff]  ;;  %v591_v22 = vld [vmem:[%s834_s3] ss:$0 sm:$0xff]  ;;  %v580_v29 = vld [vmem:[#allocation10 + $0x38] sm:$0xff] }
  0x1d   :  { %v579_v30 = vld [vmem:[#allocation10 + $0x30] sm:$0xff]  ;;  %v578_v31 = vld [vmem:[#allocation10 + $0x28] sm:$0xff]  ;;  %v577_v32 = vld [vmem:[#allocation10 + $0x20] sm:$0xff] }
  0x1e   :  { %v576_v36 = vld [vmem:[#allocation10 + $0x18] sm:$0xff]  ;;  %v575_v37 = vld [vmem:[#allocation10 + $0x10] sm:$0xff]  ;;  %v574_v38 = vld [vmem:[#allocation10 + $0x8] sm:$0xff] }
  0x1f   :  { %185 = vmatpush.bf16.msra.mxu0 %v562_v2  ;;  %293 = vmatpush.bf16.msra.mxu2 %v571_v10  ;;  %v573_v39 = vld [vmem:[#allocation10] sm:$0xff]  ;;  %v592_v41 = vld [vmem:[%s836_s5] ss:$0 sm:$0xff]  ;;  %s753_s5 = smov [#allocation11]  }
  0x20   :  { %v593_v51 = vld [vmem:[%s838_s7] ss:$0 sm:$0xff]  ;;  %s431_s10 = sshll.u32 %s753_s5, 4  ;;  %s432_s10 = int_to_ptr.vmem [resolvable:$true] %s431_s10 }
  0x23   :  { %186 = vmatpush.bf16.msra.mxu0 %v561_v3  ;;  %294 = vmatpush.bf16.msra.mxu2 %v570_v11 }
  0x27   :  { %187 = vmatpush.bf16.msra.mxu0 %v560_v4  ;;  %295 = vmatpush.bf16.msra.mxu2 %v569_v12 }
  0x2b   :  { %188 = vmatpush.bf16.msra.mxu0 %v559_v5  ;;  %296 = vmatpush.bf16.msra.mxu2 %v568_v17 }
  0x2f   :  { %189 = vmatpush.bf16.msra.mxu0 %v558_v6  ;;  %297 = vmatpush.bf16.msra.mxu2 %v567_v18 }
  0x33   :  { %190 = vmatpush.bf16.msra.mxu0 %v557_v7  ;;  %298 = vmatpush.bf16.msra.mxu2 %v566_v19 }
  0x36   :  { %191 = vmatmul.bf16.vlgmr.msra.gmra.mxu0 %v556_v8 }
  0x37   :  { %299 = vmatpush.bf16.msra.mxu2 %v565_v20 }
  0xb3   :  { %v192_v13 = vpop.f32.mrf.mxu0 }
  0xbb   :  { %v194_v14 = vpop.f32.mrf.mxu0 }
  0xbc   :  { %v197_v15 = vpack.c.bf16 %v194_v14, %v192_v13 }
  0xbe   :  { %218 = vmatpush.bf16.msra.mxu1 %v197_v15 }
  0xc1   :  { %488 = vmatmul.msk.bf16.vlgmr.msra.gmra.mxu1 %vm207_vm0, %v555_v16 }
  0xc2   :  { %392 = vmatpush.bf16.msrb.mxu1 %v580_v29 }
  0xc6   :  { %393 = vmatpush.bf16.msrb.mxu1 %v579_v30 }
  0xca   :  { %394 = vmatpush.bf16.msrb.mxu1 %v578_v31 }
  0xce   :  { %395 = vmatpush.bf16.msrb.mxu1 %v577_v32 }
  0xd2   :  { %396 = vmatpush.bf16.msrb.mxu1 %v576_v36 }
  0xd6   :  { %397 = vmatpush.bf16.msrb.mxu1 %v575_v37 }
  0xda   :  { %398 = vmatpush.bf16.msrb.mxu1 %v574_v38 }
  0xde   :  { %399 = vmatpush.bf16.msrb.mxu1 %v573_v39 }
 0x13e   :  { %v220_v21 = vpop.f32.mrf.mxu1 }
 0x13f   :  { %v221_v23 = vadd.f32 %v591_v22, %v220_v21 }
 0x141   :  { %v225_v26 = vmax.f32 %v221_v23, 0.0 }
 0x146   :  { %v222_v24 = vpop.f32.mrf.mxu1 }
 0x147   :  { %v223_v25 = vadd.f32 %v591_v22, %v222_v24 }
 0x149   :  { %v226_v27 = vmax.f32 %v223_v25, 0.0 }
 0x14b   :  { %v227_v28 = vpack.c.bf16 %v226_v27, %v225_v26 }
 0x14d   :  { %300 = vmatmul.bf16.vlgmr.msra.gmra.mxu2 %v227_v28 }
 0x1d0   :  { %v301_v33 = vpop.f32.mrf.mxu2 }
 0x1d8   :  { %v303_v34 = vpop.f32.mrf.mxu2 }
 0x1d9   :  { %v306_v35 = vpack.c.bf16 %v303_v34, %v301_v33 }
 0x1db   :  { %318 = vmatpush.bf16.msra.mxu3 %v306_v35 }
 0x1de   :  { %521 = vmatmul.msk.bf16.vlgmr.msra.gmra.mxu3 %vm207_vm0, %v555_v16 }
 0x261   :  { %v320_v40 = vpop.f32.mrf.mxu3 }
 0x262   :  { %v321_v42 = vadd.f32 %v592_v41, %v320_v40 }
 0x264   :  { %v325_v45 = vmax.f32 %v321_v42, 0.0 }
 0x269   :  { %v322_v43 = vpop.f32.mrf.mxu3 }
 0x26a   :  { %v323_v44 = vadd.f32 %v592_v41, %v322_v43 }
 0x26c   :  { %v326_v46 = vmax.f32 %v323_v44, 0.0 }
 0x26e   :  { %v327_v47 = vpack.c.bf16 %v326_v46, %v325_v45 }
 0x270   :  { %400 = vmatmul.bf16.vlgmr.msrb.gmra.mxu1 %v327_v47 }
 0x2ed   :  { %v401_v48 = vpop.f32.mrf.mxu1 }
 0x2f5   :  { %v403_v49 = vpop.f32.mrf.mxu1 }
 0x2f6   :  { %v406_v50 = vpack.c.bf16 %v403_v49, %v401_v48 }
 0x2f8   :  { %418 = vmatpush.bf16.msrb.mxu3 %v406_v50 }
 0x2fb   :  { %554 = vmatmul.msk.bf16.vlgmr.msrb.gmra.mxu3 %vm207_vm0, %v555_v16 }
 0x37e   :  { %v420_v52 = vpop.f32.mrf.mxu3 }
 0x37f   :  { %v421_v53 = vadd.f32 %v593_v51, %v420_v52 }
 0x381   :  { %425 = vst [vmem:[#allocation11] sm:$0xff] %v421_v53 }
 0x386   :  { %v422_v54 = vpop.f32.mrf.mxu3 }
 0x387   :  { %v423_v55 = vadd.f32 %v593_v51, %v422_v54 }
 0x389   :  { %426 = vst [vmem:[#allocation11 + $0x8] sm:$0xff] %v423_v55 }
 0x38a   :  { %439 = dma.vmem_to_hbm [thread:$0]  %s432_s10, 256, %s434_s13, [#allocation4], %s754_s14, %s754_s14, %s755_s15  }
 0x38b   :  { %744 = dma.done.wait [#allocation4], 256  }
 0x38c   :  { %745 = vsyncadd [#allocation4], 4294967040 }
 0x38d   :  { %444 = vsyncpa [#allocation3], 1 }
 0x38e   :  { %445 = vsyncpa [#allocation6], 1 }
 0x38f   :  { %446 = vsyncpa [#allocation9], 1 }
 0x390   :  { %447 = vsyncpa [#allocation4], 1 }

</bundles_post_ra>
